<compile_context>
chip_gen: v7x
topology: tpu7x:2x2x1
jax: 0.10.0
libtpu: 0.0.40
codegen_flags: <defaults>
</compile_context>

<pallas_src>
import numpy as np
import jax
import jax.numpy as jnp
from jax.experimental import pallas as pl
from jax.experimental.pallas import tpu as pltpu

# ---------------- synthetic FLAME sizes (small) ----------------
B = 8                      # batch (FlameConfig default batch_size)
V = 128                    # mesh vertices
NJ = 5                     # joints: [global, neck, jaw, eye_L, eye_R]
PARENTS = [-1, 0, 1, 1, 1]
NECK_KIN_CHAIN = [1, 0]    # NECK_IDX=1 walked to root
SHAPE_PARAMS, SHAPE_PAD = 8, 4
EXPR_PARAMS, EXPR_PAD = 6, 2
D = SHAPE_PARAMS + SHAPE_PAD + EXPR_PARAMS + EXPR_PAD   # betas dim (= 20)
P = (NJ - 1) * 9                                        # pose-feature dim (= 36)
KIN = D + P + 1            # blendshape matmul depth (+1 = template row)
NF = 64                    # triangles
LS = 8                     # static landmarks
LD = 5                     # dynamic contour landmarks
NDYN = 79                  # dynamic embedding table rows (angles 0..78)


# ---------------- single fused Pallas kernel --------------------------------
def _flame_kernel(bp_ref, dirs_ref, acoef_ref, wT_ref, out_ref):
    # (1) fused shape+pose blendshapes + template add, one bf16 MXU matmul:
    #     bp = [betas | pose_feature | 1]   (B, D+P+1)  bf16
    #     dirs = [shapedirs ; posedirs ; v_template]   (D+P+1, 3V)  bf16
    vflat = jnp.dot(bp_ref[...], dirs_ref[...],
                    preferred_element_type=jnp.float32)         # (B, 3V) f32

    # (2) LBS + world-transform coefficients in one matmul.
    #     acoef row layout (per batch b): b*32 + c*8 + r
    #       c in 0..3 = affine column (x, y, z, translation)
    #       r in 0..2 = model-space output coord, 3..5 = world-space, 6..7 = 0
    #     S[row, v] = sum_j acoef[row, j] * lbs_w[v, j]
    S = jnp.dot(acoef_ref[...], wT_ref[...],
                preferred_element_type=jnp.float32)              # (B*32, V)
    # TODO(synk): at NJ=5 this uses <4% of the MXU depth; a 5-term VPU FMA
    # (acoef[:, j:j+1] * wT[j]) would overlap with matmul (1), kept as MXU
    # for guaranteed lowering.

    # (3) combine: every slice is sublane/lane aligned and each per-batch
    #     result is a full (8, V) tile -> single unmasked store per batch.
    for b in range(B):                       # unrolled at trace time
        vp0 = vflat[b:b + 1, 0 * V:1 * V]    # (1, V)
        vp1 = vflat[b:b + 1, 1 * V:2 * V]
        vp2 = vflat[b:b + 1, 2 * V:3 * V]
        sb = S[b * 32:(b + 1) * 32, :]       # (32, V), aligned
        out_ref[b] = (sb[0:8] * vp0 + sb[8:16] * vp1
                      + sb[16:24] * vp2 + sb[24:32])             # (8, V)


def run_flame_kernel(bp, dirs, acoef, lbs_w_T):
    # No grid: single invocation, whole operands resident in VMEM
    # (everything together is ~100 KB) -> no pipeline prologue / double buffers.
    return pl.pallas_call(
        _flame_kernel,
        in_specs=[pl.BlockSpec(memory_space=pltpu.MemorySpace.VMEM)] * 4,
        out_specs=pl.BlockSpec(memory_space=pltpu.MemorySpace.VMEM),
        out_shape=jax.ShapeDtypeStruct((B, 8, V), jnp.float32),
    )(bp, dirs, acoef, lbs_w_T)


# ---------------- tiny glue math (per-joint; stays in plain JAX) -------------
def batch_rodrigues(rot_vecs, epsilon=1e-8):
    n = rot_vecs.shape[0]
    angle = jnp.linalg.norm(rot_vecs + epsilon, axis=1, keepdims=True)  # (n,1)
    rot_dir = rot_vecs / angle
    cos = jnp.cos(angle)[:, None]            # (n,1,1)
    sin = jnp.sin(angle)[:, None]
    rx, ry, rz = rot_dir[:, 0], rot_dir[:, 1], rot_dir[:, 2]
    zeros = jnp.zeros((n,), jnp.float32)
    K = jnp.stack([zeros, -rz, ry, rz, zeros, -rx, -ry, rx, zeros],
                  axis=1).reshape(n, 3, 3)
    ident = jnp.eye(3, dtype=jnp.float32)[None]
    return ident + sin * K + (1.0 - cos) * jnp.matmul(K, K)


def batch_rigid_transform(rot_mats, joints):
    # rot_mats (B,NJ,3,3), joints (B,NJ,3) -> (posed_joints, rel transforms A)
    rel_joints = joints.at[:, 1:].add(-joints[:, jnp.array(PARENTS[1:])])
    tmats = jnp.concatenate([rot_mats, rel_joints[..., None]], axis=-1)
    bottom = jnp.broadcast_to(jnp.array([0.0, 0.0, 0.0, 1.0], jnp.float32),
                              (B, NJ, 1, 4))
    tmats = jnp.concatenate([tmats, bottom], axis=-2)        # (B,NJ,4,4)
    chain = [tmats[:, 0]]
    for i in range(1, NJ):
        chain.append(jnp.matmul(chain[PARENTS[i]], tmats[:, i]))
    transforms = jnp.stack(chain, axis=1)                    # (B,NJ,4,4)
    posed_joints = transforms[:, :, :3, 3]
    jh = jnp.concatenate([joints, jnp.zeros((B, NJ, 1), jnp.float32)],
                         axis=2)[..., None]                  # (B,NJ,4,1)
    rel = jnp.matmul(transforms, jh)
    A = transforms - jnp.concatenate(
        [jnp.zeros((B, NJ, 4, 3), jnp.float32), rel], axis=-1)
    return posed_joints, A


def rot_mat_to_euler(rot_mats):
    sy = jnp.sqrt(rot_mats[:, 0, 0] ** 2 + rot_mats[:, 1, 0] ** 2)
    return jnp.arctan2(-rot_mats[:, 2, 0], sy)


def euler_xyz_to_rotmat(angles):
    # TODO(synk): exact Pose.from_euler convention of the original (dreifus)
    # library is unknown; assuming intrinsic 'XYZ' (scipy): R = Rx @ Ry @ Rz.
    x, y, z = angles[0], angles[1], angles[2]
    cx, sx = jnp.cos(x), jnp.sin(x)
    cy, sy = jnp.cos(y), jnp.sin(y)
    cz, sz = jnp.cos(z), jnp.sin(z)
    one, zero = jnp.float32(1.0), jnp.float32(0.0)
    Rx = jnp.stack([jnp.stack([one, zero, zero]),
                    jnp.stack([zero, cx, -sx]),
                    jnp.stack([zero, sx, cx])])
    Ry = jnp.stack([jnp.stack([cy, zero, sy]),
                    jnp.stack([zero, one, zero]),
                    jnp.stack([-sy, zero, cy])])
    Rz = jnp.stack([jnp.stack([cz, -sz, zero]),
                    jnp.stack([sz, cz, zero]),
                    jnp.stack([zero, zero, one])])
    return Rx @ Ry @ Rz


def find_dynamic_lmk(full_pose, params):
    chain = jnp.array(NECK_KIN_CHAIN)
    aa_pose = full_pose.reshape(B, NJ, 3)[:, chain]            # (B,2,3)
    rmats = batch_rodrigues(aa_pose.reshape(-1, 3)).reshape(
        B, len(NECK_KIN_CHAIN), 3, 3)
    rel = jnp.broadcast_to(jnp.eye(3, dtype=jnp.float32), (B, 3, 3))
    for i in range(len(NECK_KIN_CHAIN)):
        rel = jnp.matmul(rmats[:, i], rel)
    y = jnp.round(jnp.minimum(-rot_mat_to_euler(rel) * 180.0 / np.pi,
                              39.0)).astype(jnp.int32)
    neg_mask = (y < 0).astype(jnp.int32)
    mask = (y < -39).astype(jnp.int32)
    neg_vals = mask * 78 + (1 - mask) * (39 - y)
    y = neg_mask * neg_vals + (1 - neg_mask) * y
    return params["dyn_lmk_faces_idx"][y], params["dyn_lmk_bary"][y]


def vertices2landmarks_k3(verts_k3, faces, lmk_faces_idx, lmk_bary):
    # verts_k3: (B, 3, V) lane-dense layout; gather only the landmark vertices
    # (avoids transposing the full mesh).
    lmk_faces = faces[lmk_faces_idx]                            # (B,L,3) vert ids
    # advanced indices separated by a slice -> result (B, L, 3_face, 3_xyz)
    lmk_vertices = verts_k3[jnp.arange(B)[:, None, None], :, lmk_faces]
    return jnp.einsum("blfi,blf->bli", lmk_vertices, lmk_bary)


# ---------------- full FLAME forward ----------------------------------------
def flame_forward(params, shape_params, expression_params, pose_params,
                  neck_pose, eye_pose, transl, rotation, scale):
    betas = jnp.concatenate(
        [shape_params, jnp.zeros((B, SHAPE_PAD), jnp.float32),
         expression_params, jnp.zeros((B, EXPR_PAD), jnp.float32)], axis=1)
    full_pose = jnp.concatenate(
        [pose_params[:, :3], neck_pose, pose_params[:, 3:], eye_pose], axis=1)

    # --- tiny per-joint glue (NJ=5) -----------------------------------------
    rot_mats = batch_rodrigues(full_pose.reshape(-1, 3)).reshape(B, NJ, 3, 3)
    pose_feature = (rot_mats[:, 1:] -
                    jnp.eye(3, dtype=jnp.float32)).reshape(B, P)

    # joint regression folded into precomputed regressors (exact, linear):
    # joints = J_reg @ (template + shapedirs . betas)
    joints = params["J_template"][None] + jnp.einsum(
        "bd,jkd->bjk", betas, params["J_shapedirs"])            # (B,NJ,3)

    _, A = batch_rigid_transform(rot_mats, joints)              # (B,NJ,4,4)

    # model-to-world 4x4 (built from rotation[0], transl[0], scale[0] as torch)
    Rw = euler_xyz_to_rotmat(rotation[0])
    M = jnp.eye(4, dtype=jnp.float32)
    M = M.at[:3, :3].set(Rw * scale[0]).at[:3, 3].set(transl[0])

    # Pre-compose M@A so the world transform rides the same LBS matmul.
    # (Relies on LBS weights summing to 1 per vertex, true for FLAME.)
    # Sublane-aligned packing: row = b*32 + c*8 + r
    #   r 0..2 -> A[b, j, r, c],  r 3..5 -> (M@A)[b, j, r-3, c],  r 6..7 -> 0
    MA = jnp.einsum("rc,bjcd->bjrd", M[:3, :], A)               # (B,NJ,3,4)
    blk = jnp.concatenate(
        [A[:, :, :3, :], MA, jnp.zeros((B, NJ, 2, 4), jnp.float32)],
        axis=2)                                                 # (B,NJ,8,4)
    acoef = jnp.transpose(blk, (0, 3, 2, 1)).reshape(B * 32, NJ)

    # [betas | pose_feature | 1] -> the 1 multiplies the template row of dirs.
    bp = jnp.concatenate(
        [betas, pose_feature, jnp.ones((B, 1), jnp.float32)], axis=1)  # (B,KIN)

    # --- single fused Pallas kernel -----------------------------------------
    out = run_flame_kernel(bp.astype(jnp.bfloat16), params["dirs_stacked"],
                           acoef, params["lbs_w_T"])            # (B, 8, V)
    verts_k3 = out[:, 0:3, :]                                   # model space
    vworld_k3 = out[:, 3:6, :]                                  # world space

    vertices_world = jnp.transpose(vworld_k3, (0, 2, 1))        # (B,V,3) output

    # --- landmarks (data-dependent gathers: plain JAX glue) -----------------
    dyn_faces_idx, dyn_bary = find_dynamic_lmk(full_pose, params)
    lmk_faces_idx = jnp.concatenate(
        [dyn_faces_idx,
         jnp.broadcast_to(params["lmk_faces_idx"][None], (B, LS))], axis=1)
    lmk_bary = jnp.concatenate(
        [dyn_bary, jnp.broadcast_to(params["lmk_bary"][None], (B, LS, 3))],
        axis=1)
    landmarks = vertices2landmarks_k3(verts_k3, params["faces"],
                                      lmk_faces_idx, lmk_bary)

    aux = dict(betas=betas, pose_feature=pose_feature, A=A, M=M,
               joints=joints, verts_k3=verts_k3)
    return vertices_world, landmarks, aux


# ---------------- pure-JAX reference for the kernel math --------------------
def reference_verts(raw, betas, pose_feature, A, M):
    v_shaped = raw["v_template"][None] + jnp.einsum(
        "bd,vkd->bvk", betas, raw["shapedirs_raw"])
    joints = jnp.einsum("jv,bvk->bjk", raw["J_reg"], v_shaped)
    v_posed = v_shaped + jnp.einsum("bp,pvk->bvk", pose_feature,
                                    raw["posedirs_raw"])
    T = jnp.einsum("vj,bjkc->bvkc", raw["lbs_w"], A)            # (B,V,4,4)
    homo = jnp.concatenate([v_posed, jnp.ones((B, V, 1), jnp.float32)], -1)
    verts = jnp.einsum("bvkc,bvc->bvk", T[:, :, :3, :], homo)
    verts_world = verts @ M[:3, :3].T + M[:3, 3]
    return joints, verts, verts_world


# ---------------- main -------------------------------------------------------
if __name__ == "__main__":
    key = jax.random.PRNGKey(0)
    ks = jax.random.split(key, 20)

    def _bf16_round(x):
        # model buffers are stored in bf16 (halves the only large operand DMA);
        # round once so kernel and reference see identical data.
        return x.astype(jnp.bfloat16).astype(jnp.float32)

    # deterministic synthetic FLAME "model" parameters
    v_template = _bf16_round(jax.random.normal(ks[0], (V, 3), jnp.float32) * 0.1)
    shapedirs_raw = _bf16_round(
        jax.random.normal(ks[1], (V, 3, D), jnp.float32) * 0.01)
    posedirs_raw = _bf16_round(
        jax.random.normal(ks[2], (P, V, 3), jnp.float32) * 0.01)
    jr = jax.random.uniform(ks[3], (NJ, V), jnp.float32)
    J_reg = jr / jr.sum(axis=1, keepdims=True)
    lbs_w = jax.nn.softmax(jax.random.normal(ks[4], (V, NJ), jnp.float32) * 2.0,
                           axis=1)
    faces = jax.random.randint(ks[5], (NF, 3), 0, V)
    lmk_faces_idx = jax.random.randint(ks[6], (LS,), 0, NF)
    lb = jax.random.uniform(ks[7], (LS, 3), jnp.float32) + 0.1
    lmk_bary = lb / lb.sum(axis=1, keepdims=True)
    dyn_lmk_faces_idx = jax.random.randint(ks[8], (NDYN, LD), 0, NF)
    db = jax.random.uniform(ks[9], (NDYN, LD, 3), jnp.float32) + 0.1
    dyn_lmk_bary = db / db.sum(axis=2, keepdims=True)

    # derived kernel-friendly layouts (done once at model setup, like buffers)
    shapedirs_flat = jnp.transpose(shapedirs_raw, (2, 1, 0)).reshape(D, 3 * V)
    posedirs_flat = jnp.transpose(posedirs_raw, (0, 2, 1)).reshape(P, 3 * V)
    v_template_flat = v_template.T.reshape(1, 3 * V)             # [0, k*V+v]
    dirs_stacked = jnp.concatenate(
        [shapedirs_flat, posedirs_flat, v_template_flat],
        axis=0).astype(jnp.bfloat16)                             # (KIN, 3V)
    params = dict(
        dirs_stacked=dirs_stacked,
        lbs_w_T=lbs_w.T,                                         # (NJ, V)
        J_template=jnp.einsum("jv,vk->jk", J_reg, v_template),   # (NJ, 3)
        J_shapedirs=jnp.einsum("jv,vkd->jkd", J_reg, shapedirs_raw),
        faces=faces, lmk_faces_idx=lmk_faces_idx, lmk_bary=lmk_bary,
        dyn_lmk_faces_idx=dyn_lmk_faces_idx, dyn_lmk_bary=dyn_lmk_bary,
    )
    raw = dict(v_template=v_template, shapedirs_raw=shapedirs_raw,
               posedirs_raw=posedirs_raw, J_reg=J_reg, lbs_w=lbs_w)

    # forward inputs
    shape_params = jax.random.normal(ks[10], (B, SHAPE_PARAMS), jnp.float32)
    expression_params = jax.random.normal(ks[11], (B, EXPR_PARAMS), jnp.float32)
    pose_params = jax.random.normal(ks[12], (B, 6), jnp.float32) * 0.3
    neck_pose = jnp.zeros((B, 3), jnp.float32)
    eye_pose = jnp.zeros((B, 6), jnp.float32)
    transl = jax.random.normal(ks[13], (B, 3), jnp.float32) * 0.1
    rotation = jax.random.normal(ks[14], (B, 3), jnp.float32) * 0.2
    scale = jax.random.uniform(ks[15], (B,), jnp.float32, 0.8, 1.3)

    fwd = jax.jit(flame_forward)
    vertices_world, landmarks, aux = fwd(
        params, shape_params, expression_params, pose_params,
        neck_pose, eye_pose, transl, rotation, scale)
    jax.block_until_ready((vertices_world, landmarks))

    # correctness check of the Pallas-kernel math against a pure-JAX reference
    with jax.default_matmul_precision("highest"):
        joints_ref, verts_model_ref, verts_world_ref = reference_verts(
            raw, aux["betas"], aux["pose_feature"], aux["A"], aux["M"])
        jax.block_until_ready((joints_ref, verts_model_ref, verts_world_ref))

    verts_model = np.transpose(np.asarray(aux["verts_k3"]), (0, 2, 1))
    assert vertices_world.shape == (B, V, 3)
    assert landmarks.shape == (B, LD + LS, 3)
    assert np.allclose(np.asarray(aux["joints"]), np.asarray(joints_ref),
                       atol=5e-3, rtol=5e-3)
    assert np.allclose(verts_model, np.asarray(verts_model_ref),
                       atol=5e-3, rtol=5e-3)
    assert np.allclose(np.asarray(vertices_world), np.asarray(verts_world_ref),
                       atol=5e-3, rtol=5e-3)
    assert np.all(np.isfinite(np.asarray(landmarks)))

    print("KERNEL_OK")
</pallas_src>

<mosaic_0001>
module attributes {stable_mosaic.version = 11 : i64} {
  func.func @_flame_kernel(%arg0: memref<8x57xbf16, #tpu.memory_space<vmem>>, %arg1: memref<57x384xbf16, #tpu.memory_space<vmem>>, %arg2: memref<256x5xf32, #tpu.memory_space<vmem>>, %arg3: memref<5x128xf32, #tpu.memory_space<vmem>>, %arg4: memref<8x8x128xf32, #tpu.memory_space<vmem>>) attributes {dimension_semantics = [], scalar_prefetch = 0 : i64, scratch_operands = 0 : i64, tpu.core_type = #tpu.core_type<tc>} {
    %c0 = arith.constant 0 : index
    %c0_0 = arith.constant 0 : index
    %0 = vector.load %arg0[%c0, %c0_0] : memref<8x57xbf16, #tpu.memory_space<vmem>>, vector<8x57xbf16>
    %c0_1 = arith.constant 0 : index
    %c0_2 = arith.constant 0 : index
    %1 = vector.load %arg1[%c0_1, %c0_2] : memref<57x384xbf16, #tpu.memory_space<vmem>>, vector<57x384xbf16>
    %cst = arith.constant dense<0.000000e+00> : vector<8x384xf32>
    %2 = tpu.matmul %0, %1, %cst {dimension_numbers = #tpu.dot_dimension_numbers<[1], [0], [0], [1], [0, 0, 1, 1], [], []>} : vector<8x57xbf16>, vector<57x384xbf16>, vector<8x384xf32> -> vector<8x384xf32>
    %c0_3 = arith.constant 0 : index
    %c0_4 = arith.constant 0 : index
    %3 = vector.load %arg2[%c0_3, %c0_4] : memref<256x5xf32, #tpu.memory_space<vmem>>, vector<256x5xf32>
    %c0_5 = arith.constant 0 : index
    %c0_6 = arith.constant 0 : index
    %4 = vector.load %arg3[%c0_5, %c0_6] : memref<5x128xf32, #tpu.memory_space<vmem>>, vector<5x128xf32>
    %cst_7 = arith.constant dense<0.000000e+00> : vector<256x128xf32>
    %5 = tpu.matmul %3, %4, %cst_7 {dimension_numbers = #tpu.dot_dimension_numbers<[1], [0], [0], [1], [0, 0, 1, 1], [], []>} : vector<256x5xf32>, vector<5x128xf32>, vector<256x128xf32> -> vector<256x128xf32>
    %6 = vector.extract_strided_slice %2 {offsets = [0, 0], sizes = [1, 128], strides = [1, 1]} : vector<8x384xf32> to vector<1x128xf32>
    %7 = vector.extract_strided_slice %2 {offsets = [0, 128], sizes = [1, 128], strides = [1, 1]} : vector<8x384xf32> to vector<1x128xf32>
    %8 = vector.extract_strided_slice %2 {offsets = [0, 256], sizes = [1, 128], strides = [1, 1]} : vector<8x384xf32> to vector<1x128xf32>
    %9 = vector.extract_strided_slice %5 {offsets = [0, 0], sizes = [32, 128], strides = [1, 1]} : vector<256x128xf32> to vector<32x128xf32>
    %10 = vector.extract_strided_slice %9 {offsets = [0, 0], sizes = [8, 128], strides = [1, 1]} : vector<32x128xf32> to vector<8x128xf32>
    %11 = vector.broadcast %6 : vector<1x128xf32> to vector<8x128xf32>
    %12 = arith.mulf %10, %11 : vector<8x128xf32>
    %13 = vector.extract_strided_slice %9 {offsets = [8, 0], sizes = [8, 128], strides = [1, 1]} : vector<32x128xf32> to vector<8x128xf32>
    %14 = vector.broadcast %7 : vector<1x128xf32> to vector<8x128xf32>
    %15 = arith.mulf %13, %14 : vector<8x128xf32>
    %16 = arith.addf %12, %15 : vector<8x128xf32>
    %17 = vector.extract_strided_slice %9 {offsets = [16, 0], sizes = [8, 128], strides = [1, 1]} : vector<32x128xf32> to vector<8x128xf32>
    %18 = vector.broadcast %8 : vector<1x128xf32> to vector<8x128xf32>
    %19 = arith.mulf %17, %18 : vector<8x128xf32>
    %20 = arith.addf %16, %19 : vector<8x128xf32>
    %21 = vector.extract_strided_slice %9 {offsets = [24, 0], sizes = [8, 128], strides = [1, 1]} : vector<32x128xf32> to vector<8x128xf32>
    %22 = arith.addf %20, %21 : vector<8x128xf32>
    %c0_8 = arith.constant 0 : index
    %c0_9 = arith.constant 0 : index
    %c0_10 = arith.constant 0 : index
    %23 = vector.load %arg4[%c0_8, %c0_9, %c0_10] : memref<8x8x128xf32, #tpu.memory_space<vmem>>, vector<1x8x128xf32>
    %24 = vector.shape_cast %23 : vector<1x8x128xf32> to vector<8x128xf32>
    %25 = vector.shape_cast %22 : vector<8x128xf32> to vector<1x8x128xf32>
    tpu.vector_store %arg4[%c0_8, %c0_9, %c0_10], %25 {strides = array<i32>} : memref<8x8x128xf32, #tpu.memory_space<vmem>>, vector<1x8x128xf32>,
    %26 = vector.extract_strided_slice %2 {offsets = [1, 0], sizes = [1, 128], strides = [1, 1]} : vector<8x384xf32> to vector<1x128xf32>
    %27 = vector.extract_strided_slice %2 {offsets = [1, 128], sizes = [1, 128], strides = [1, 1]} : vector<8x384xf32> to vector<1x128xf32>
    %28 = vector.extract_strided_slice %2 {offsets = [1, 256], sizes = [1, 128], strides = [1, 1]} : vector<8x384xf32> to vector<1x128xf32>
    %29 = vector.extract_strided_slice %5 {offsets = [32, 0], sizes = [32, 128], strides = [1, 1]} : vector<256x128xf32> to vector<32x128xf32>
    %30 = vector.extract_strided_slice %29 {offsets = [0, 0], sizes = [8, 128], strides = [1, 1]} : vector<32x128xf32> to vector<8x128xf32>
    %31 = vector.broadcast %26 : vector<1x128xf32> to vector<8x128xf32>
    %32 = arith.mulf %30, %31 : vector<8x128xf32>
    %33 = vector.extract_strided_slice %29 {offsets = [8, 0], sizes = [8, 128], strides = [1, 1]} : vector<32x128xf32> to vector<8x128xf32>
    %34 = vector.broadcast %27 : vector<1x128xf32> to vector<8x128xf32>
    %35 = arith.mulf %33, %34 : vector<8x128xf32>
    %36 = arith.addf %32, %35 : vector<8x128xf32>
    %37 = vector.extract_strided_slice %29 {offsets = [16, 0], sizes = [8, 128], strides = [1, 1]} : vector<32x128xf32> to vector<8x128xf32>
    %38 = vector.broadcast %28 : vector<1x128xf32> to vector<8x128xf32>
    %39 = arith.mulf %37, %38 : vector<8x128xf32>
    %40 = arith.addf %36, %39 : vector<8x128xf32>
    %41 = vector.extract_strided_slice %29 {offsets = [24, 0], sizes = [8, 128], strides = [1, 1]} : vector<32x128xf32> to vector<8x128xf32>
    %42 = arith.addf %40, %41 : vector<8x128xf32>
    %c1 = arith.constant 1 : index
    %c0_11 = arith.constant 0 : index
    %c0_12 = arith.constant 0 : index
    %43 = vector.load %arg4[%c1, %c0_11, %c0_12] : memref<8x8x128xf32, #tpu.memory_space<vmem>>, vector<1x8x128xf32>
    %44 = vector.shape_cast %43 : vector<1x8x128xf32> to vector<8x128xf32>
    %45 = vector.shape_cast %42 : vector<8x128xf32> to vector<1x8x128xf32>
    tpu.vector_store %arg4[%c1, %c0_11, %c0_12], %45 {strides = array<i32>} : memref<8x8x128xf32, #tpu.memory_space<vmem>>, vector<1x8x128xf32>,
    %46 = vector.extract_strided_slice %2 {offsets = [2, 0], sizes = [1, 128], strides = [1, 1]} : vector<8x384xf32> to vector<1x128xf32>
    %47 = vector.extract_strided_slice %2 {offsets = [2, 128], sizes = [1, 128], strides = [1, 1]} : vector<8x384xf32> to vector<1x128xf32>
    %48 = vector.extract_strided_slice %2 {offsets = [2, 256], sizes = [1, 128], strides = [1, 1]} : vector<8x384xf32> to vector<1x128xf32>
    %49 = vector.extract_strided_slice %5 {offsets = [64, 0], sizes = [32, 128], strides = [1, 1]} : vector<256x128xf32> to vector<32x128xf32>
    %50 = vector.extract_strided_slice %49 {offsets = [0, 0], sizes = [8, 128], strides = [1, 1]} : vector<32x128xf32> to vector<8x128xf32>
    %51 = vector.broadcast %46 : vector<1x128xf32> to vector<8x128xf32>
    %52 = arith.mulf %50, %51 : vector<8x128xf32>
    %53 = vector.extract_strided_slice %49 {offsets = [8, 0], sizes = [8, 128], strides = [1, 1]} : vector<32x128xf32> to vector<8x128xf32>
    %54 = vector.broadcast %47 : vector<1x128xf32> to vector<8x128xf32>
    %55 = arith.mulf %53, %54 : vector<8x128xf32>
    %56 = arith.addf %52, %55 : vector<8x128xf32>
    %57 = vector.extract_strided_slice %49 {offsets = [16, 0], sizes = [8, 128], strides = [1, 1]} : vector<32x128xf32> to vector<8x128xf32>
    %58 = vector.broadcast %48 : vector<1x128xf32> to vector<8x128xf32>
    %59 = arith.mulf %57, %58 : vector<8x128xf32>
    %60 = arith.addf %56, %59 : vector<8x128xf32>
    %61 = vector.extract_strided_slice %49 {offsets = [24, 0], sizes = [8, 128], strides = [1, 1]} : vector<32x128xf32> to vector<8x128xf32>
    %62 = arith.addf %60, %61 : vector<8x128xf32>
    %c2 = arith.constant 2 : index
    %c0_13 = arith.constant 0 : index
    %c0_14 = arith.constant 0 : index
    %63 = vector.load %arg4[%c2, %c0_13, %c0_14] : memref<8x8x128xf32, #tpu.memory_space<vmem>>, vector<1x8x128xf32>
    %64 = vector.shape_cast %63 : vector<1x8x128xf32> to vector<8x128xf32>
    %65 = vector.shape_cast %62 : vector<8x128xf32> to vector<1x8x128xf32>
    tpu.vector_store %arg4[%c2, %c0_13, %c0_14], %65 {strides = array<i32>} : memref<8x8x128xf32, #tpu.memory_space<vmem>>, vector<1x8x128xf32>,
    %66 = vector.extract_strided_slice %2 {offsets = [3, 0], sizes = [1, 128], strides = [1, 1]} : vector<8x384xf32> to vector<1x128xf32>
    %67 = vector.extract_strided_slice %2 {offsets = [3, 128], sizes = [1, 128], strides = [1, 1]} : vector<8x384xf32> to vector<1x128xf32>
    %68 = vector.extract_strided_slice %2 {offsets = [3, 256], sizes = [1, 128], strides = [1, 1]} : vector<8x384xf32> to vector<1x128xf32>
    %69 = vector.extract_strided_slice %5 {offsets = [96, 0], sizes = [32, 128], strides = [1, 1]} : vector<256x128xf32> to vector<32x128xf32>
    %70 = vector.extract_strided_slice %69 {offsets = [0, 0], sizes = [8, 128], strides = [1, 1]} : vector<32x128xf32> to vector<8x128xf32>
    %71 = vector.broadcast %66 : vector<1x128xf32> to vector<8x128xf32>
    %72 = arith.mulf %70, %71 : vector<8x128xf32>
    %73 = vector.extract_strided_slice %69 {offsets = [8, 0], sizes = [8, 128], strides = [1, 1]} : vector<32x128xf32> to vector<8x128xf32>
    %74 = vector.broadcast %67 : vector<1x128xf32> to vector<8x128xf32>
    %75 = arith.mulf %73, %74 : vector<8x128xf32>
    %76 = arith.addf %72, %75 : vector<8x128xf32>
    %77 = vector.extract_strided_slice %69 {offsets = [16, 0], sizes = [8, 128], strides = [1, 1]} : vector<32x128xf32> to vector<8x128xf32>
    %78 = vector.broadcast %68 : vector<1x128xf32> to vector<8x128xf32>
    %79 = arith.mulf %77, %78 : vector<8x128xf32>
    %80 = arith.addf %76, %79 : vector<8x128xf32>
    %81 = vector.extract_strided_slice %69 {offsets = [24, 0], sizes = [8, 128], strides = [1, 1]} : vector<32x128xf32> to vector<8x128xf32>
    %82 = arith.addf %80, %81 : vector<8x128xf32>
    %c3 = arith.constant 3 : index
    %c0_15 = arith.constant 0 : index
    %c0_16 = arith.constant 0 : index
    %83 = vector.load %arg4[%c3, %c0_15, %c0_16] : memref<8x8x128xf32, #tpu.memory_space<vmem>>, vector<1x8x128xf32>
    %84 = vector.shape_cast %83 : vector<1x8x128xf32> to vector<8x128xf32>
    %85 = vector.shape_cast %82 : vector<8x128xf32> to vector<1x8x128xf32>
    tpu.vector_store %arg4[%c3, %c0_15, %c0_16], %85 {strides = array<i32>} : memref<8x8x128xf32, #tpu.memory_space<vmem>>, vector<1x8x128xf32>,
    %86 = vector.extract_strided_slice %2 {offsets = [4, 0], sizes = [1, 128], strides = [1, 1]} : vector<8x384xf32> to vector<1x128xf32>
    %87 = vector.extract_strided_slice %2 {offsets = [4, 128], sizes = [1, 128], strides = [1, 1]} : vector<8x384xf32> to vector<1x128xf32>
    %88 = vector.extract_strided_slice %2 {offsets = [4, 256], sizes = [1, 128], strides = [1, 1]} : vector<8x384xf32> to vector<1x128xf32>
    %89 = vector.extract_strided_slice %5 {offsets = [128, 0], sizes = [32, 128], strides = [1, 1]} : vector<256x128xf32> to vector<32x128xf32>
    %90 = vector.extract_strided_slice %89 {offsets = [0, 0], sizes = [8, 128], strides = [1, 1]} : vector<32x128xf32> to vector<8x128xf32>
    %91 = vector.broadcast %86 : vector<1x128xf32> to vector<8x128xf32>
    %92 = arith.mulf %90, %91 : vector<8x128xf32>
    %93 = vector.extract_strided_slice %89 {offsets = [8, 0], sizes = [8, 128], strides = [1, 1]} : vector<32x128xf32> to vector<8x128xf32>
    %94 = vector.broadcast %87 : vector<1x128xf32> to vector<8x128xf32>
    %95 = arith.mulf %93, %94 : vector<8x128xf32>
    %96 = arith.addf %92, %95 : vector<8x128xf32>
    %97 = vector.extract_strided_slice %89 {offsets = [16, 0], sizes = [8, 128], strides = [1, 1]} : vector<32x128xf32> to vector<8x128xf32>
    %98 = vector.broadcast %88 : vector<1x128xf32> to vector<8x128xf32>
    %99 = arith.mulf %97, %98 : vector<8x128xf32>
    %100 = arith.addf %96, %99 : vector<8x128xf32>
    %101 = vector.extract_strided_slice %89 {offsets = [24, 0], sizes = [8, 128], strides = [1, 1]} : vector<32x128xf32> to vector<8x128xf32>
    %102 = arith.addf %100, %101 : vector<8x128xf32>
    %c4 = arith.constant 4 : index
    %c0_17 = arith.constant 0 : index
    %c0_18 = arith.constant 0 : index
    %103 = vector.load %arg4[%c4, %c0_17, %c0_18] : memref<8x8x128xf32, #tpu.memory_space<vmem>>, vector<1x8x128xf32>
    %104 = vector.shape_cast %103 : vector<1x8x128xf32> to vector<8x128xf32>
    %105 = vector.shape_cast %102 : vector<8x128xf32> to vector<1x8x128xf32>
    tpu.vector_store %arg4[%c4, %c0_17, %c0_18], %105 {strides = array<i32>} : memref<8x8x128xf32, #tpu.memory_space<vmem>>, vector<1x8x128xf32>,
    %106 = vector.extract_strided_slice %2 {offsets = [5, 0], sizes = [1, 128], strides = [1, 1]} : vector<8x384xf32> to vector<1x128xf32>
    %107 = vector.extract_strided_slice %2 {offsets = [5, 128], sizes = [1, 128], strides = [1, 1]} : vector<8x384xf32> to vector<1x128xf32>
    %108 = vector.extract_strided_slice %2 {offsets = [5, 256], sizes = [1, 128], strides = [1, 1]} : vector<8x384xf32> to vector<1x128xf32>
    %109 = vector.extract_strided_slice %5 {offsets = [160, 0], sizes = [32, 128], strides = [1, 1]} : vector<256x128xf32> to vector<32x128xf32>
    %110 = vector.extract_strided_slice %109 {offsets = [0, 0], sizes = [8, 128], strides = [1, 1]} : vector<32x128xf32> to vector<8x128xf32>
    %111 = vector.broadcast %106 : vector<1x128xf32> to vector<8x128xf32>
    %112 = arith.mulf %110, %111 : vector<8x128xf32>
    %113 = vector.extract_strided_slice %109 {offsets = [8, 0], sizes = [8, 128], strides = [1, 1]} : vector<32x128xf32> to vector<8x128xf32>
    %114 = vector.broadcast %107 : vector<1x128xf32> to vector<8x128xf32>
    %115 = arith.mulf %113, %114 : vector<8x128xf32>
    %116 = arith.addf %112, %115 : vector<8x128xf32>
    %117 = vector.extract_strided_slice %109 {offsets = [16, 0], sizes = [8, 128], strides = [1, 1]} : vector<32x128xf32> to vector<8x128xf32>
    %118 = vector.broadcast %108 : vector<1x128xf32> to vector<8x128xf32>
    %119 = arith.mulf %117, %118 : vector<8x128xf32>
    %120 = arith.addf %116, %119 : vector<8x128xf32>
    %121 = vector.extract_strided_slice %109 {offsets = [24, 0], sizes = [8, 128], strides = [1, 1]} : vector<32x128xf32> to vector<8x128xf32>
    %122 = arith.addf %120, %121 : vector<8x128xf32>
    %c5 = arith.constant 5 : index
    %c0_19 = arith.constant 0 : index
    %c0_20 = arith.constant 0 : index
    %123 = vector.load %arg4[%c5, %c0_19, %c0_20] : memref<8x8x128xf32, #tpu.memory_space<vmem>>, vector<1x8x128xf32>
    %124 = vector.shape_cast %123 : vector<1x8x128xf32> to vector<8x128xf32>
    %125 = vector.shape_cast %122 : vector<8x128xf32> to vector<1x8x128xf32>
    tpu.vector_store %arg4[%c5, %c0_19, %c0_20], %125 {strides = array<i32>} : memref<8x8x128xf32, #tpu.memory_space<vmem>>, vector<1x8x128xf32>,
    %126 = vector.extract_strided_slice %2 {offsets = [6, 0], sizes = [1, 128], strides = [1, 1]} : vector<8x384xf32> to vector<1x128xf32>
    %127 = vector.extract_strided_slice %2 {offsets = [6, 128], sizes = [1, 128], strides = [1, 1]} : vector<8x384xf32> to vector<1x128xf32>
    %128 = vector.extract_strided_slice %2 {offsets = [6, 256], sizes = [1, 128], strides = [1, 1]} : vector<8x384xf32> to vector<1x128xf32>
    %129 = vector.extract_strided_slice %5 {offsets = [192, 0], sizes = [32, 128], strides = [1, 1]} : vector<256x128xf32> to vector<32x128xf32>
    %130 = vector.extract_strided_slice %129 {offsets = [0, 0], sizes = [8, 128], strides = [1, 1]} : vector<32x128xf32> to vector<8x128xf32>
    %131 = vector.broadcast %126 : vector<1x128xf32> to vector<8x128xf32>
    %132 = arith.mulf %130, %131 : vector<8x128xf32>
    %133 = vector.extract_strided_slice %129 {offsets = [8, 0], sizes = [8, 128], strides = [1, 1]} : vector<32x128xf32> to vector<8x128xf32>
    %134 = vector.broadcast %127 : vector<1x128xf32> to vector<8x128xf32>
    %135 = arith.mulf %133, %134 : vector<8x128xf32>
    %136 = arith.addf %132, %135 : vector<8x128xf32>
    %137 = vector.extract_strided_slice %129 {offsets = [16, 0], sizes = [8, 128], strides = [1, 1]} : vector<32x128xf32> to vector<8x128xf32>
    %138 = vector.broadcast %128 : vector<1x128xf32> to vector<8x128xf32>
    %139 = arith.mulf %137, %138 : vector<8x128xf32>
    %140 = arith.addf %136, %139 : vector<8x128xf32>
    %141 = vector.extract_strided_slice %129 {offsets = [24, 0], sizes = [8, 128], strides = [1, 1]} : vector<32x128xf32> to vector<8x128xf32>
    %142 = arith.addf %140, %141 : vector<8x128xf32>
    %c6 = arith.constant 6 : index
    %c0_21 = arith.constant 0 : index
    %c0_22 = arith.constant 0 : index
    %143 = vector.load %arg4[%c6, %c0_21, %c0_22] : memref<8x8x128xf32, #tpu.memory_space<vmem>>, vector<1x8x128xf32>
    %144 = vector.shape_cast %143 : vector<1x8x128xf32> to vector<8x128xf32>
    %145 = vector.shape_cast %142 : vector<8x128xf32> to vector<1x8x128xf32>
    tpu.vector_store %arg4[%c6, %c0_21, %c0_22], %145 {strides = array<i32>} : memref<8x8x128xf32, #tpu.memory_space<vmem>>, vector<1x8x128xf32>,
    %146 = vector.extract_strided_slice %2 {offsets = [7, 0], sizes = [1, 128], strides = [1, 1]} : vector<8x384xf32> to vector<1x128xf32>
    %147 = vector.extract_strided_slice %2 {offsets = [7, 128], sizes = [1, 128], strides = [1, 1]} : vector<8x384xf32> to vector<1x128xf32>
    %148 = vector.extract_strided_slice %2 {offsets = [7, 256], sizes = [1, 128], strides = [1, 1]} : vector<8x384xf32> to vector<1x128xf32>
    %149 = vector.extract_strided_slice %5 {offsets = [224, 0], sizes = [32, 128], strides = [1, 1]} : vector<256x128xf32> to vector<32x128xf32>
    %150 = vector.extract_strided_slice %149 {offsets = [0, 0], sizes = [8, 128], strides = [1, 1]} : vector<32x128xf32> to vector<8x128xf32>
    %151 = vector.broadcast %146 : vector<1x128xf32> to vector<8x128xf32>
    %152 = arith.mulf %150, %151 : vector<8x128xf32>
    %153 = vector.extract_strided_slice %149 {offsets = [8, 0], sizes = [8, 128], strides = [1, 1]} : vector<32x128xf32> to vector<8x128xf32>
    %154 = vector.broadcast %147 : vector<1x128xf32> to vector<8x128xf32>
    %155 = arith.mulf %153, %154 : vector<8x128xf32>
    %156 = arith.addf %152, %155 : vector<8x128xf32>
    %157 = vector.extract_strided_slice %149 {offsets = [16, 0], sizes = [8, 128], strides = [1, 1]} : vector<32x128xf32> to vector<8x128xf32>
    %158 = vector.broadcast %148 : vector<1x128xf32> to vector<8x128xf32>
    %159 = arith.mulf %157, %158 : vector<8x128xf32>
    %160 = arith.addf %156, %159 : vector<8x128xf32>
    %161 = vector.extract_strided_slice %149 {offsets = [24, 0], sizes = [8, 128], strides = [1, 1]} : vector<32x128xf32> to vector<8x128xf32>
    %162 = arith.addf %160, %161 : vector<8x128xf32>
    %c7 = arith.constant 7 : index
    %c0_23 = arith.constant 0 : index
    %c0_24 = arith.constant 0 : index
    %163 = vector.load %arg4[%c7, %c0_23, %c0_24] : memref<8x8x128xf32, #tpu.memory_space<vmem>>, vector<1x8x128xf32>
    %164 = vector.shape_cast %163 : vector<1x8x128xf32> to vector<8x128xf32>
    %165 = vector.shape_cast %162 : vector<8x128xf32> to vector<1x8x128xf32>
    tpu.vector_store %arg4[%c7, %c0_23, %c0_24], %165 {strides = array<i32>} : memref<8x8x128xf32, #tpu.memory_space<vmem>>, vector<1x8x128xf32>,
    return
  }
}

</mosaic_0001>

<bundles_post_ra>
// kernel: flame_forward.1
= control target key start
LH: loop header
LB: loop body
LE: loop exit
PB: predicated region body
PF: predicated region fallthrough
CT: control target
= control target key end

     0   :  { %vm100_vm0 = vcmask 1043456   ;;  %v891_v0 = vmov 0.0   ;;  %vm101_vm1 = vcmask 1044480   ;;  %vm892_vm2 = vmmov 0   ;;  %s1159_s1 = inlined_call_operand.vmem [shape: bf16[57,384], index: 1, kind: input, shape index: {}]   ;;  %s1160_s3 = inlined_call_operand.vmem [shape: f32[5,128], index: 3, kind: input, shape index: {}]   ;;  %s1161_s0 = inlined_call_operand.vmem [shape: bf16[8,57], index: 0, kind: input, shape index: {}]   ;;  %s1162_s2 = inlined_call_operand.vmem [shape: f32[256,5], index: 2, kind: input, shape index: {}]   ;;  %s1163_s4 = inlined_call_operand.vmem [shape: f32[8,8,128], index: 4, kind: output, shape index: {}]  }
   0x1   :  { %807 = vmatprep.subr.bf16.mxu1 %v891_v0  ;;  %v875_v1 = vld [vmem:[%s1159_s1 + $0x4] ss:$12 sps:$4 sm:$0xff]   ;;  %v877_v2 = vld [vmem:[%s1159_s1 + $0x8] ss:$12 sps:$4 sm:$0xff]   ;;  %815 = vmatprep.mubr.msk.bf16.mxu1 %vm892_vm2, %v891_v0  ;;  %v878_v3 = vld [vmem:[%s1159_s1] ss:$12 sps:$4 sm:$0xff]   ;;  %v552_v54 = vlaneseq }
   0x2   :  { %113 = vmatprep.subr.bf16.mxu0 %v875_v1  ;;  %v893_v4 = vmov 65535   ;;  %808 = vmatpush3.bf16.msra.mxu1 %v877_v2  ;;  %v879_v6 = vld [vmem:[%s1159_s1 + $0x1c] ss:$12 sps:$4 sm:$0xff]   ;;  %v894_v7 = vmov 0   ;;  %v881_v8 = vld [vmem:[%s1159_s1 + $0x20] ss:$12 sps:$4 sm:$0xff]  }
   0x3   :  { %v102_v5 = vsel %vm100_vm0, 4294967295, %v893_v4  ;;  %145 = vmatprep.mubr.bf16.mxu0 %v894_v7  ;;  %114 = vmatpush1.bf16.msra.mxu0 %v878_v3  ;;  %v882_v9 = vld [vmem:[%s1159_s1 + $0x18] ss:$12 sps:$4 sm:$0xff]   ;;  %v883_v10 = vld [vmem:[%s1159_s1 + $0x34] ss:$12 sps:$4 sm:$0xff]   ;;  %vm96_vm3 = vcmask 465920  }
   0x4   :  { %809 = vmatprep.subr.bf16.mxu1 %v891_v0  ;;  %115 = vmatprep.subr.bf16.mxu0 %v879_v6  ;;  %v885_v11 = vld [vmem:[%s1159_s1 + $0x38] ss:$12 sps:$4 sm:$0xff]   ;;  %v103_v12 = vsel %vm101_vm1, %v102_v5, 0  ;;  %v886_v14 = vld [vmem:[%s1159_s1 + $0x30] ss:$12 sps:$4 sm:$0xff]   ;;  %vm227_vm4 = vcmask 39936  }
   0x5   :  { %v887_v13 = vld [vmem:[%s1159_s1 + $0x4c] ss:$12 sps:$4 sm:$0x1f]   ;;  %v889_v16 = vld [vmem:[%s1159_s1 + $0x50] ss:$12 sps:$4 sm:$0x1f]  }
   0x6   :  { %810 = vmatpush3.bf16.msra.mxu1 %v881_v8  ;;  %v108_v15 = vand.u32 %v887_v13, %v103_v12  ;;  %v890_v17 = vld [vmem:[%s1159_s1 + $0x48] ss:$12 sps:$4 sm:$0x1f]   ;;  %v111_v18 = vand.u32 %v889_v16, %v103_v12  ;;  %v226_v20 = vld [vmem:[%s1160_s3] sm:$0x1f]  ;;  %v213_v28 = vld [vmem:[%s1162_s2 + $0x98] sm:$0xff] }
   0x7   :  { %116 = vmatpush1.bf16.msra.mxu0 %v882_v9  ;;  %811 = vmatprep.subr.bf16.mxu1 %v891_v0  ;;  %v105_v19 = vand.u32 %v890_v17, %v103_v12  ;;  %v18_v21 = vld [vmem:[%s1161_s0] sm:$0xf]  ;;  %v211_v24 = vld [vmem:[%s1162_s2 + $0x88] sm:$0xff]  ;;  %v212_v26 = vld [vmem:[%s1162_s2 + $0x90] sm:$0xff]  ;;  %v1095_v55 = vshrl.u32 %v552_v54, 7 }
   0x8   :  { %117 = vmatprep.subr.bf16.mxu0 %v883_v10  ;;  %v210_v22 = vld [vmem:[%s1162_s2 + $0x80] sm:$0xff]  ;;  %v195_v25 = vld [vmem:[%s1162_s2 + $0x8] sm:$0xff]  ;;  %v196_v27 = vld [vmem:[%s1162_s2 + $0x10] sm:$0xff] }
   0x9   :  { %v194_v23 = vld [vmem:[%s1162_s2] sm:$0xff]  ;;  %v197_v29 = vld [vmem:[%s1162_s2 + $0x18] sm:$0xff]  ;;  %v215_v32 = vld [vmem:[%s1162_s2 + $0xa8] sm:$0xff]  ;;  %v633_v63 = vsub.s32 4, %v1095_v55  ;;  %v554_v1 = vsub.s32 0, %v1095_v55 }
   0xa   :  { %812 = vmatpush3.bf16.msra.mxu1 %v885_v11  ;;  %v214_v30 = vld [vmem:[%s1162_s2 + $0xa0] sm:$0xff]  ;;  %v199_v33 = vld [vmem:[%s1162_s2 + $0x28] sm:$0xff]  ;;  %v216_v34 = vld [vmem:[%s1162_s2 + $0xb0] sm:$0xff] }
   0xb   :  { %118 = vmatpush1.bf16.msra.mxu0 %v886_v14  ;;  %813 = vmatprep.subr.bf16.mxu1 %v891_v0  ;;  %v198_v31 = vld [vmem:[%s1162_s2 + $0x20] sm:$0xff]  ;;  %v200_v35 = vld [vmem:[%s1162_s2 + $0x30] sm:$0xff]  ;;  %v217_v36 = vld [vmem:[%s1162_s2 + $0xb8] sm:$0xff]  ;;  %v653_v14 = vsub.s32 5, %v1095_v55 }
   0xc   :  { %119 = vmatprep.subr.bf16.mxu0 %v108_v15  ;;  %v201_v37 = vld [vmem:[%s1162_s2 + $0x38] sm:$0xff]  ;;  %v218_v38 = vld [vmem:[%s1162_s2 + $0xc0] sm:$0xff]  ;;  %v219_v40 = vld [vmem:[%s1162_s2 + $0xc8] sm:$0xff] }
   0xd   :  { %v202_v39 = vld [vmem:[%s1162_s2 + $0x40] sm:$0xff]  ;;  %v203_v41 = vld [vmem:[%s1162_s2 + $0x48] sm:$0xff]  ;;  %v220_v42 = vld [vmem:[%s1162_s2 + $0xd0] sm:$0xff] }
   0xe   :  { %814 = vmatpush3.bf16.msra.mxu1 %v111_v18  ;;  %v204_v43 = vld [vmem:[%s1162_s2 + $0x50] sm:$0xff]  ;;  %v221_v44 = vld [vmem:[%s1162_s2 + $0xd8] sm:$0xff]  ;;  %v222_v46 = vld [vmem:[%s1162_s2 + $0xe0] sm:$0xff]  ;;  %v573_v18 = vsub.s32 1, %v1095_v55 }
   0xf   :  { %120 = vmatpush1.bf16.msra.mxu0 %v105_v19  ;;  %869 = vmatprep.subr.msk.mxu1 %vm101_vm1, %v226_v20  ;;  %v205_v45 = vld [vmem:[%s1162_s2 + $0x58] sm:$0xff]  ;;  %v206_v47 = vld [vmem:[%s1162_s2 + $0x60] sm:$0xff]  ;;  %v223_v48 = vld [vmem:[%s1162_s2 + $0xe8] sm:$0xff] }
  0x10   :  { %819 = vmatprep.subr.msk.mxu0 %vm101_vm1, %v226_v20  ;;  %v207_v49 = vld [vmem:[%s1162_s2 + $0x68] sm:$0xff]  ;;  %v224_v50 = vld [vmem:[%s1162_s2 + $0xf0] sm:$0xff]  ;;  %v225_v52 = vld [vmem:[%s1162_s2 + $0xf8] sm:$0xff] }
  0x11   :  { %816 = vmatmul.mubr.msk.bf16.vlgmr.msra.gmra.mrb[0].mxu1 %vm96_vm3, %v18_v21  ;;  %v208_v51 = vld [vmem:[%s1162_s2 + $0x70] sm:$0xff]  ;;  %v209_v53 = vld [vmem:[%s1162_s2 + $0x78] sm:$0xff] }
  0x12   :  { %727 = vmatmul.mubr.msk.bf16.vlgmr.msra.gmra.mrb[0].mxu0 %vm96_vm3, %v18_v21  ;;  %870 = vmatpush3.msk.msra.mxu1 %vm101_vm1, %v226_v20 }
  0x13   :  { %820 = vmatpush3.msk.msra.mxu0 %vm101_vm1, %v226_v20  ;;  %845 = vmatprep.mubr.msk.f32.mxu1 %vm227_vm4, %v210_v22 }
  0x14   :  { %821 = vmatprep.mubr.msk.f32.mxu0 %vm227_vm4, %v194_v23 }
  0x19   :  { %846 = vmatmul.mubr.msk.f32.vlgmr.msra.gmra.mrb[4].mxu1 %vm227_vm4, %v211_v24 }
  0x1a   :  { %822 = vmatmul.mubr.msk.f32.vlgmr.msra.gmra.mrb[4].mxu0 %vm227_vm4, %v195_v25  ;;  %848 = vmatprep.mubr.msk.f32.mxu1 %vm227_vm4, %v212_v26 }
  0x1b   :  { %824 = vmatprep.mubr.msk.f32.mxu0 %vm227_vm4, %v196_v27 }
  0x1d   :  { %849 = vmatmul.mubr.msk.f32.gmra.mrb[6].mxu1 %vm227_vm4, %v213_v28 }
  0x1e   :  { %825 = vmatmul.mubr.msk.f32.gmra.mrb[6].mxu0 %vm227_vm4, %v197_v29  ;;  %851 = vmatprep.mubr.msk.f32.mxu1 %vm227_vm4, %v214_v30 }
  0x1f   :  { %827 = vmatprep.mubr.msk.f32.mxu0 %vm227_vm4, %v198_v31 }
  0x21   :  { %852 = vmatmul.mubr.msk.f32.gmra.mrb[8].mxu1 %vm227_vm4, %v215_v32 }
  0x22   :  { %828 = vmatmul.mubr.msk.f32.gmra.mrb[8].mxu0 %vm227_vm4, %v199_v33  ;;  %854 = vmatprep.mubr.msk.f32.mxu1 %vm227_vm4, %v216_v34 }
  0x23   :  { %830 = vmatprep.mubr.msk.f32.mxu0 %vm227_vm4, %v200_v35 }
  0x25   :  { %855 = vmatmul.mubr.msk.f32.gmra.mrb[10].mxu1 %vm227_vm4, %v217_v36 }
  0x26   :  { %831 = vmatmul.mubr.msk.f32.gmra.mrb[10].mxu0 %vm227_vm4, %v201_v37  ;;  %857 = vmatprep.mubr.msk.f32.mxu1 %vm227_vm4, %v218_v38 }
  0x27   :  { %833 = vmatprep.mubr.msk.f32.mxu0 %vm227_vm4, %v202_v39 }
  0x29   :  { %858 = vmatmul.mubr.msk.f32.gmra.mrb[12].mxu1 %vm227_vm4, %v219_v40 }
  0x2a   :  { %834 = vmatmul.mubr.msk.f32.gmra.mrb[12].mxu0 %vm227_vm4, %v203_v41  ;;  %860 = vmatprep.mubr.msk.f32.mxu1 %vm227_vm4, %v220_v42  ;;  %v673_v42 = vsub.s32 6, %v1095_v55 }
  0x2b   :  { %836 = vmatprep.mubr.msk.f32.mxu0 %vm227_vm4, %v204_v43 }
  0x2d   :  { %861 = vmatmul.mubr.msk.f32.gmra.mrb[14].mxu1 %vm227_vm4, %v221_v44 }
  0x2e   :  { %837 = vmatmul.mubr.msk.f32.gmra.mrb[14].mxu0 %vm227_vm4, %v205_v45  ;;  %863 = vmatprep.mubr.msk.f32.mxu1 %vm227_vm4, %v222_v46  ;;  %v593_v46 = vsub.s32 2, %v1095_v55 }
  0x2f   :  { %839 = vmatprep.mubr.msk.f32.mxu0 %vm227_vm4, %v206_v47 }
  0x31   :  { %864 = vmatmul.mubr.msk.f32.gmra.mrb[16].mxu1 %vm227_vm4, %v223_v48 }
  0x32   :  { %840 = vmatmul.mubr.msk.f32.gmra.mrb[16].mxu0 %vm227_vm4, %v207_v49  ;;  %866 = vmatprep.mubr.msk.f32.mxu1 %vm227_vm4, %v224_v50 }
  0x33   :  { %842 = vmatprep.mubr.msk.f32.mxu0 %vm227_vm4, %v208_v51 }
  0x35   :  { %867 = vmatmul.mubr.msk.f32.gmra.mrb[18].mxu1 %vm227_vm4, %v225_v52 }
  0x36   :  { %843 = vmatmul.mubr.msk.f32.gmra.mrb[18].mxu0 %vm227_vm4, %v209_v53 }
  0xe4   :  { %v1097_v56 = vpop.f32.mrb[0].mxu1 }
  0xe5   :  { %v1099_v57 = vpop.f32.mrb[0].mxu0  ;;  %v817_v58 = vpop.f32.mrb[1].mxu1  ;;  %v645_v17 = vrot.slane %v1097_v56, %v633_v63  ;;  %v566_v22 = vrot.slane %v1097_v56, %v554_v1  ;;  %v665_v45 = vrot.slane %v1097_v56, %v653_v14  ;;  %v585_v50 = vrot.slane %v1097_v56, %v573_v18 }
  0xe6   :  { %v1101_v59 = vpop.f32.mrb[1].mxu0  ;;  %v191_v60 = vpop.f32.mrb[2].mxu1  ;;  %v634_v5 = vrot.slane %v1099_v57, %v633_v63  ;;  %v555_v9 = vrot.slane %v1099_v57, %v554_v1  ;;  %v654_v30 = vrot.slane %v1099_v57, %v653_v14  ;;  %v574_v35 = vrot.slane %v1099_v57, %v573_v18 }
  0xe7   :  { %v151_v61 = vpop.f32.mrb[2].mxu0  ;;  %v818_v62 = vpop.f32.mrb[3].mxu1  ;;  %v639_v2 = vrot.slane %v1101_v59, %v633_v63  ;;  %v560_v4 = vrot.slane %v1101_v59, %v554_v1  ;;  %v659_v26 = vrot.slane %v1101_v59, %v653_v14  ;;  %v579_v29 = vrot.slane %v1101_v59, %v573_v18 }
  0xe8   :  { %v152_v0 = vpop.f32.mrb[3].mxu0  ;;  %v679_v54 = vrot.slane %v1101_v59, %v673_v42  ;;  %v599_v61 = vrot.slane %v1101_v59, %v593_v46  ;;  %v674_v62 = vrot.slane %v1099_v57, %v673_v42  ;;  %v613_v14 = vsub.s32 3, %v1095_v55 }
  0xe9   :  { %v605_v18 = vrot.slane %v1097_v56, %v593_v46 }
  0xec   :  { %v847_v3 = vpop.f32.mrb[4].mxu1 }
  0xed   :  { %v640_v6 = vmul.f32 %v847_v3, %v639_v2  ;;  %v823_v7 = vpop.f32.mrb[4].mxu0  ;;  %v473_v8 = vpop.f32.mrb[5].mxu1  ;;  %v594_v3 = vrot.slane %v1099_v57, %v593_v46 }
  0xee   :  { %v561_v10 = vmul.f32 %v823_v7, %v560_v4  ;;  %v635_v11 = vmul.f32 %v634_v5, %v473_v8  ;;  %v393_v12 = vpop.f32.mrb[5].mxu0 }
  0xef   :  { %v556_v13 = vmul.f32 %v555_v9, %v393_v12 }
  0xf0   :  { %v641_v15 = vadd.f32 %v640_v6, %v635_v11  ;;  %v850_v16 = vpop.f32.mrb[6].mxu1 }
  0xf1   :  { %v562_v19 = vadd.f32 %v561_v10, %v556_v13  ;;  %v826_v20 = vpop.f32.mrb[6].mxu0  ;;  %v483_v21 = vpop.f32.mrb[7].mxu1  ;;  %v693_v10 = vsub.s32 7, %v1095_v55  ;;  %v685_v13 = vrot.slane %v1097_v56, %v673_v42 }
  0xf2   :  { %v646_v23 = vmul.f32 %v645_v17, %v483_v21  ;;  %v403_v24 = vpop.f32.mrb[7].mxu0 }
  0xf3   :  { %v567_v25 = vmul.f32 %v566_v22, %v403_v24  ;;  %v699_v22 = vrot.slane %v1101_v59, %v693_v10  ;;  %v694_v55 = vrot.slane %v1099_v57, %v693_v10 }
  0xf4   :  { %v647_v27 = vadd.f32 %v646_v23, %v641_v15  ;;  %v853_v28 = vpop.f32.mrb[8].mxu1 }
  0xf5   :  { %v568_v31 = vadd.f32 %v567_v25, %v562_v19  ;;  %v660_v32 = vmul.f32 %v853_v28, %v659_v26  ;;  %v829_v33 = vpop.f32.mrb[8].mxu0  ;;  %v493_v34 = vpop.f32.mrb[9].mxu1  ;;  %v619_v25 = vrot.slane %v1101_v59, %v613_v14 }
  0xf6   :  { %v648_v36 = vadd.f32 %v850_v16, %v647_v27  ;;  %v580_v37 = vmul.f32 %v829_v33, %v579_v29  ;;  %v655_v38 = vmul.f32 %v654_v30, %v493_v34  ;;  %v413_v39 = vpop.f32.mrb[9].mxu0  ;;  %v614_v30 = vrot.slane %v1099_v57, %v613_v14 }
  0xf7   :  { %v569_v40 = vadd.f32 %v826_v20, %v568_v31  ;;  %v575_v41 = vmul.f32 %v574_v35, %v413_v39 }
  0xf8   :  { %765 = vst [vmem:[%s1163_s4 + $0x20] sm:$0xff] %v648_v36  ;;  %v661_v43 = vadd.f32 %v660_v32, %v655_v38  ;;  %v856_v44 = vpop.f32.mrb[10].mxu1  ;;  %v705_v38 = vrot.slane %v1097_v56, %v693_v10 }
  0xf9   :  { %570 = vst [vmem:[%s1163_s4] sm:$0xff] %v569_v40  ;;  %v581_v47 = vadd.f32 %v580_v37, %v575_v41  ;;  %v832_v48 = vpop.f32.mrb[10].mxu0  ;;  %v503_v49 = vpop.f32.mrb[11].mxu1  ;;  %v625_v41 = vrot.slane %v1097_v56, %v613_v14 }
  0xfa   :  { %v666_v51 = vmul.f32 %v665_v45, %v503_v49  ;;  %v423_v52 = vpop.f32.mrb[11].mxu0 }
  0xfb   :  { %v586_v53 = vmul.f32 %v585_v50, %v423_v52 }
  0xfc   :  { %v667_v58 = vadd.f32 %v666_v51, %v661_v43  ;;  %v859_v60 = vpop.f32.mrb[12].mxu1 }
  0xfd   :  { %v587_v63 = vadd.f32 %v586_v53, %v581_v47  ;;  %v680_v0 = vmul.f32 %v859_v60, %v679_v54  ;;  %v835_v1 = vpop.f32.mrb[12].mxu0  ;;  %v513_v2 = vpop.f32.mrb[13].mxu1 }
  0xfe   :  { %v668_v4 = vadd.f32 %v856_v44, %v667_v58  ;;  %v600_v5 = vmul.f32 %v835_v1, %v599_v61  ;;  %v675_v6 = vmul.f32 %v674_v62, %v513_v2  ;;  %v433_v7 = vpop.f32.mrb[13].mxu0 }
  0xff   :  { %v588_v8 = vadd.f32 %v832_v48, %v587_v63  ;;  %v595_v9 = vmul.f32 %v594_v3, %v433_v7 }
 0x100   :  { %766 = vst [vmem:[%s1163_s4 + $0x28] sm:$0xff] %v668_v4  ;;  %v681_v11 = vadd.f32 %v680_v0, %v675_v6  ;;  %v862_v12 = vpop.f32.mrb[14].mxu1 }
 0x101   :  { %762 = vst [vmem:[%s1163_s4 + $0x8] sm:$0xff] %v588_v8  ;;  %v601_v15 = vadd.f32 %v600_v5, %v595_v9  ;;  %v838_v16 = vpop.f32.mrb[14].mxu0  ;;  %v523_v17 = vpop.f32.mrb[15].mxu1 }
 0x102   :  { %v686_v19 = vmul.f32 %v685_v13, %v523_v17  ;;  %v443_v20 = vpop.f32.mrb[15].mxu0 }
 0x103   :  { %v606_v21 = vmul.f32 %v605_v18, %v443_v20 }
 0x104   :  { %v687_v23 = vadd.f32 %v686_v19, %v681_v11  ;;  %v865_v24 = vpop.f32.mrb[16].mxu1 }
 0x105   :  { %v607_v26 = vadd.f32 %v606_v21, %v601_v15  ;;  %v700_v27 = vmul.f32 %v865_v24, %v699_v22  ;;  %v841_v28 = vpop.f32.mrb[16].mxu0  ;;  %v533_v29 = vpop.f32.mrb[17].mxu1 }
 0x106   :  { %v688_v31 = vadd.f32 %v862_v12, %v687_v23  ;;  %v620_v32 = vmul.f32 %v841_v28, %v619_v25  ;;  %v695_v33 = vmul.f32 %v694_v55, %v533_v29  ;;  %v453_v34 = vpop.f32.mrb[17].mxu0 }
 0x107   :  { %v608_v35 = vadd.f32 %v838_v16, %v607_v26  ;;  %v615_v36 = vmul.f32 %v614_v30, %v453_v34 }
 0x108   :  { %767 = vst [vmem:[%s1163_s4 + $0x30] sm:$0xff] %v688_v31  ;;  %v701_v37 = vadd.f32 %v700_v27, %v695_v33  ;;  %v868_v59 = vpop.f32.mrb[18].mxu1 }
 0x109   :  { %763 = vst [vmem:[%s1163_s4 + $0x10] sm:$0xff] %v608_v35  ;;  %v621_v39 = vadd.f32 %v620_v32, %v615_v36  ;;  %v844_v57 = vpop.f32.mrb[18].mxu0  ;;  %v543_v40 = vpop.f32.mrb[19].mxu1 }
 0x10a   :  { %v706_v42 = vmul.f32 %v705_v38, %v543_v40  ;;  %v463_v43 = vpop.f32.mrb[19].mxu0 }
 0x10b   :  { %v626_v44 = vmul.f32 %v625_v41, %v463_v43 }
 0x10c   :  { %v707_v45 = vadd.f32 %v706_v42, %v701_v37 }
 0x10d   :  { %v627_v46 = vadd.f32 %v626_v44, %v621_v39 }
 0x10e   :  { %v708_v47 = vadd.f32 %v868_v59, %v707_v45 }
 0x10f   :  { %v628_v48 = vadd.f32 %v844_v57, %v627_v46 }
 0x110   :  { %768 = vst [vmem:[%s1163_s4 + $0x38] sm:$0xff] %v708_v47 }
 0x111   :  { %764 = vst [vmem:[%s1163_s4 + $0x18] sm:$0xff] %v628_v48 }

</bundles_post_ra>
